<compile_context>
chip_gen: v5e
topology: v5e:2x2
jax: 0.10.0
libtpu: 0.0.40
codegen_flags: <defaults>
</compile_context>

<pallas_src>
import jax
import jax.numpy as jnp
import numpy as np
from jax.experimental import pallas as pl
from jax.experimental.pallas import tpu as pltpu

EMB = 256  # embedding_dim in the PyTorch module


# ---------------- in-kernel helpers (refs read lazily, at point of use) ----------------
def _relu(x):
    return jnp.maximum(x, 0.0)


def _mm(x, w_ref):
    # bf16 operands on the MXU, f32 accumulation.
    return jnp.dot(x.astype(jnp.bfloat16), w_ref[...],
                   preferred_element_type=jnp.float32)


def _lin(x, w_ref, b_ref):
    # bias add (and downstream ReLU) stay in f32.
    return _mm(x, w_ref) + b_ref[...]


# ---------------- per-mode fused kernels ----------------
def _kernel_plain(x_ref, w1, b1, w2, b2, w3, b3, w4, b4, o_ref):
    # expert_mode 0 (x = state) and expert_mode 1 (x = cat([state, e]) from wrapper)
    h = _relu(_lin(x_ref[...], w1, b1))
    h = _relu(_lin(h, w2, b2))
    h = _relu(_lin(h, w3, b3))
    o_ref[...] = _lin(h, w4, b4)


def _kernel_mode2(s_ref, e_ref, w1, b1, w2, b2, w3, b3, w4h, w4e, b4, o_ref):
    h = _relu(_lin(s_ref[...], w1, b1))
    h = _relu(_lin(h, w2, b2))
    h = _relu(_lin(h, w3, b3))
    # cat([h, e]) @ W4  ==  h @ W4[:EMB] + e @ W4[EMB:]
    o_ref[...] = _mm(h, w4h) + _mm(e_ref[...], w4e) + b4[...]


def _kernel_mode3(se_ref, e_ref, w1, b1, w2h, w2e, b2, w3h, w3e, b3,
                  w4h, w4e, b4, o_ref):
    e = e_ref[...]                                   # (tb, E) bf16, small, stays live
    h = _relu(_lin(se_ref[...], w1, b1))             # cat done in wrapper, unsplit W1
    h = _relu(_mm(h, w2h) + _mm(e, w2e) + b2[...])
    h = _relu(_mm(h, w3h) + _mm(e, w3e) + b3[...])
    o_ref[...] = _mm(h, w4h) + _mm(e, w4e) + b4[...]


def _kernel_mode4(s_ref, e_ref, w1, b1, w2, b2, w3, b3, w4, b4,
                  v1, c1, v2, c2, v3, c3, v4, c4, o_ref):
    # interleave the two independent branches -> continuous MXU push stream
    h = _relu(_lin(s_ref[...], w1, b1))
    g = _relu(_lin(e_ref[...], v1, c1))
    h = _relu(_lin(h, w2, b2))
    g = _relu(_lin(g, v2, c2))
    h = _relu(_lin(h, w3, b3))
    g = _relu(_lin(g, v3, c3))
    h = _lin(h, w4, b4)                              # (tb, 8)
    g = _lin(g, v4, c4)                              # (tb, 8)
    o_ref[...] = jnp.sum(h * g, axis=-1, keepdims=True)   # VPU mul + cheap lane reduce


_KERNELS = {0: _kernel_plain, 1: _kernel_plain, 2: _kernel_mode2,
            3: _kernel_mode3, 4: _kernel_mode4}


# ---------------- wrapper: glue only (casts, splits, concat, padding) ----------------
def _round_up(x, m):
    return ((x + m - 1) // m) * m


def _bf16(x):
    return x.astype(jnp.bfloat16)


def _f32(x):
    return x.astype(jnp.float32)


def critic_ppo_forward(mode, state, e, layers, expert_layers=None, *, tb=None):
    """Pallas-backed CriticPPO.forward. `layers` hold full (torch-style concat) weights;
    splitting / concatenation glue happens here, all compute happens in the kernel."""
    B, S = state.shape
    E = e.shape[-1]

    if mode in (0, 1):
        kernel = _KERNELS[mode]
        x = state if mode == 0 else jnp.concatenate([state, e], axis=-1)
        batched = [x]
        params = []
        for (w, b) in layers:
            params += [_bf16(w), _f32(b)]
    elif mode == 2:
        kernel = _KERNELS[2]
        batched = [state, e]
        params = []
        for (w, b) in layers[:-1]:
            params += [_bf16(w), _f32(b)]
        w4, b4 = layers[-1]
        params += [_bf16(w4[:EMB]), _bf16(w4[EMB:]), _f32(b4)]
    elif mode == 3:
        kernel = _KERNELS[3]
        batched = [jnp.concatenate([state, e], axis=-1), e]
        w1, b1 = layers[0]
        params = [_bf16(w1), _f32(b1)]
        for (w, b) in layers[1:]:
            params += [_bf16(w[:EMB]), _bf16(w[EMB:]), _f32(b)]
    elif mode == 4:
        kernel = _KERNELS[4]
        batched = [state, e]
        params = []
        for (w, b) in list(layers) + list(expert_layers):
            params += [_bf16(w), _f32(b)]
    else:
        raise NotImplementedError

    # bf16 matmul operands (activations DMA'd as bf16 too; f32 accumulation in-kernel)
    batched = [_bf16(x) for x in batched]

    # Batch tiling: big MXU-friendly tile, batch padded to a tile multiple.
    if tb is None:
        tb = min(512, _round_up(B, 8))
    tb = max(8, _round_up(tb, 8))
    n_tiles = pl.cdiv(B, tb)
    Bp = n_tiles * tb
    if Bp != B:
        batched = [jnp.pad(x, ((0, Bp - B), (0, 0))) for x in batched]

    def batch_spec(feat):
        return pl.BlockSpec((tb, feat), lambda i: (i, 0))

    def full_spec(shape):
        return pl.BlockSpec(shape, lambda i: (0, 0))

    in_specs = [batch_spec(x.shape[-1]) for x in batched]
    in_specs += [full_spec(p.shape) for p in params]

    out = pl.pallas_call(
        kernel,
        out_shape=jax.ShapeDtypeStruct((Bp, 1), jnp.float32),
        grid_spec=pltpu.PrefetchScalarGridSpec(
            num_scalar_prefetch=0,
            grid=(n_tiles,),
            in_specs=in_specs,
            out_specs=pl.BlockSpec((tb, 1), lambda i: (i, 0)),
        ),
        compiler_params=pltpu.CompilerParams(
            dimension_semantics=("parallel",)),   # batch rows independent -> v7x 2 TCs
    )(*batched, *params)
    return out[:B]


# ---------------- deterministic parameter construction (synthetic, no checkpoint) ----------------
def _uniform(key, shape, bound):
    return jax.random.uniform(key, shape, jnp.float32, -bound, bound)


def linear_params(key, fan_in, fan_out):
    # mimics torch.nn.Linear default init (U[-1/sqrt(fan_in), 1/sqrt(fan_in)])
    kw, kb = jax.random.split(key)
    bound = 1.0 / np.sqrt(fan_in)
    w = _uniform(kw, (fan_in, fan_out), bound)     # stored as (in, out); forward does x @ w
    b = _uniform(kb, (1, fan_out), bound)
    return w, b


def orthogonal_linear(key, fan_in, fan_out, std=0.5, bias_const=1e-6):
    # layer_init_with_orthogonal equivalent
    a = jax.random.normal(key, (fan_in, fan_out), jnp.float32)
    q, r = jnp.linalg.qr(a)
    q = q * jnp.sign(jnp.diagonal(r))[None, :]
    w = (std * q[:, :fan_out]).astype(jnp.float32)
    b = jnp.full((1, fan_out), bias_const, jnp.float32)
    return w, b


def build_params(mode, key, S, E):
    dims_map = {
        0: [(S, EMB), (EMB, EMB), (EMB, EMB), (EMB, 1)],
        1: [(S + E, EMB), (EMB, EMB), (EMB, EMB), (EMB, 1)],
        2: [(S, EMB), (EMB, EMB), (EMB, EMB), (EMB + E, 1)],
        3: [(S + E, EMB), (EMB + E, EMB), (EMB + E, EMB), (EMB + E, 1)],
        4: [(S, EMB), (EMB, EMB), (EMB, EMB), (EMB, 8)],
    }
    keys = jax.random.split(key, 16)
    dims = dims_map[mode]
    layers = []
    for li, (fi, fo) in enumerate(dims):
        if li == len(dims) - 1:
            layers.append(orthogonal_linear(keys[li], fi, fo, std=0.5))
        else:
            layers.append(linear_params(keys[li], fi, fo))
    expert_layers = None
    if mode == 4:
        edims = [(E, EMB), (EMB, EMB), (EMB, EMB), (EMB, 8)]
        expert_layers = []
        for li, (fi, fo) in enumerate(edims):
            if li == len(edims) - 1:
                expert_layers.append(orthogonal_linear(keys[8 + li], fi, fo, std=0.5))
            else:
                expert_layers.append(linear_params(keys[8 + li], fi, fo))
    return layers, expert_layers


# ---------------- pure-JAX reference mirroring the PyTorch forward exactly ----------------
def ref_forward(mode, state, e, layers, expert_layers=None):
    def lin(x, w, b):
        return jnp.dot(x, w, precision=jax.lax.Precision.HIGHEST) + b

    if mode == 0:
        h = state
        for (w, b) in layers[:-1]:
            h = jax.nn.relu(lin(h, w, b))
        return lin(h, *layers[-1])
    if mode == 1:
        h = jnp.concatenate([state, e], axis=-1)
        for (w, b) in layers[:-1]:
            h = jax.nn.relu(lin(h, w, b))
        return lin(h, *layers[-1])
    if mode == 2:
        h = state
        for (w, b) in layers[:-1]:
            h = jax.nn.relu(lin(h, w, b))
        h = jnp.concatenate([h, e], axis=-1)
        return lin(h, *layers[-1])
    if mode == 3:
        h = state
        for (w, b) in layers[:-1]:
            h = jnp.concatenate([h, e], axis=-1)
            h = jax.nn.relu(lin(h, w, b))
        h = jnp.concatenate([h, e], axis=-1)
        return lin(h, *layers[-1])
    if mode == 4:
        h = state
        for (w, b) in layers[:-1]:
            h = jax.nn.relu(lin(h, w, b))
        h = lin(h, *layers[-1])
        g = e
        for (w, b) in expert_layers[:-1]:
            g = jax.nn.relu(lin(g, w, b))
        g = lin(g, *expert_layers[-1])
        return jnp.sum(h * g, axis=-1, keepdims=True)
    raise NotImplementedError


if __name__ == "__main__":
    key = jax.random.PRNGKey(0)
    S, E = 12, 6  # state_dim, expert_dim
    k_s, k_e, k_p = jax.random.split(key, 3)

    # B=16: tile-aligned batch; B=13: ragged batch exercising the cdiv + padding path.
    for B in (16, 13):
        state = jax.random.normal(jax.random.fold_in(k_s, B), (B, S), jnp.float32)
        e = jax.random.normal(jax.random.fold_in(k_e, B), (B, E), jnp.float32)
        for mode in range(5):
            layers, expert_layers = build_params(mode, jax.random.fold_in(k_p, mode), S, E)
            out = critic_ppo_forward(mode, state, e, layers, expert_layers)
            out = jax.block_until_ready(out)
            assert out.shape == (B, 1) and out.dtype == jnp.float32
            ref = ref_forward(mode, state, e, layers, expert_layers)
            np.testing.assert_allclose(np.asarray(out), np.asarray(ref),
                                       rtol=5e-3, atol=5e-3)

    print("KERNEL_OK")
</pallas_src>

<mosaic_0001>
module attributes {stable_mosaic.version = 11 : i64} {
  func.func @_kernel_plain(%arg0: i32, %arg1: memref<16x12xbf16, #tpu.memory_space<vmem>>, %arg2: memref<12x256xbf16, #tpu.memory_space<vmem>>, %arg3: memref<1x256xf32, #tpu.memory_space<vmem>>, %arg4: memref<256x256xbf16, #tpu.memory_space<vmem>>, %arg5: memref<1x256xf32, #tpu.memory_space<vmem>>, %arg6: memref<256x256xbf16, #tpu.memory_space<vmem>>, %arg7: memref<1x256xf32, #tpu.memory_space<vmem>>, %arg8: memref<256x1xbf16, #tpu.memory_space<vmem>>, %arg9: memref<1x1xf32, #tpu.memory_space<vmem>>, %arg10: memref<16x1xf32, #tpu.memory_space<vmem>>) attributes {dimension_semantics = [#tpu.dimension_semantics<parallel>], iteration_bounds = array<i64: 1>, scalar_prefetch = 0 : i64, scratch_operands = 0 : i64, tpu.core_type = #tpu.core_type<tc>, window_params = [{transform_indices = @transform_0, window_bounds = array<i64: 16, 12>}, {pipeline_mode = #tpu.pipeline_mode<synchronous>, transform_indices = @transform_1, window_bounds = array<i64: 12, 256>}, {pipeline_mode = #tpu.pipeline_mode<synchronous>, transform_indices = @transform_2, window_bounds = array<i64: 1, 256>}, {pipeline_mode = #tpu.pipeline_mode<synchronous>, transform_indices = @transform_3, window_bounds = array<i64: 256, 256>}, {pipeline_mode = #tpu.pipeline_mode<synchronous>, transform_indices = @transform_4, window_bounds = array<i64: 1, 256>}, {pipeline_mode = #tpu.pipeline_mode<synchronous>, transform_indices = @transform_5, window_bounds = array<i64: 256, 256>}, {pipeline_mode = #tpu.pipeline_mode<synchronous>, transform_indices = @transform_6, window_bounds = array<i64: 1, 256>}, {pipeline_mode = #tpu.pipeline_mode<synchronous>, transform_indices = @transform_7, window_bounds = array<i64: 256, 1>}, {pipeline_mode = #tpu.pipeline_mode<synchronous>, transform_indices = @transform_8, window_bounds = array<i64: 1, 1>}, {transform_indices = @transform_9, window_bounds = array<i64: 16, 1>}]} {
    %c0 = arith.constant 0 : index
    %c0_0 = arith.constant 0 : index
    %0 = vector.load %arg1[%c0, %c0_0] : memref<16x12xbf16, #tpu.memory_space<vmem>>, vector<16x12xbf16>
    %c0_1 = arith.constant 0 : index
    %c0_2 = arith.constant 0 : index
    %1 = vector.load %arg2[%c0_1, %c0_2] : memref<12x256xbf16, #tpu.memory_space<vmem>>, vector<12x256xbf16>
    %cst = arith.constant dense<0.000000e+00> : vector<16x256xf32>
    %2 = tpu.matmul %0, %1, %cst {dimension_numbers = #tpu.dot_dimension_numbers<[1], [0], [0], [1], [0, 0, 1, 1], [], []>} : vector<16x12xbf16>, vector<12x256xbf16>, vector<16x256xf32> -> vector<16x256xf32>
    %c0_3 = arith.constant 0 : index
    %c0_4 = arith.constant 0 : index
    %3 = vector.load %arg3[%c0_3, %c0_4] : memref<1x256xf32, #tpu.memory_space<vmem>>, vector<1x256xf32>
    %4 = vector.broadcast %3 : vector<1x256xf32> to vector<16x256xf32>
    %5 = arith.addf %2, %4 : vector<16x256xf32>
    %cst_5 = arith.constant 0.000000e+00 : f32
    %6 = vector.broadcast %cst_5 : f32 to vector<16x256xf32>
    %7 = arith.maximumf %5, %6 : vector<16x256xf32>
    %8 = arith.truncf %7 : vector<16x256xf32> to vector<16x256xbf16>
    %c0_6 = arith.constant 0 : index
    %c0_7 = arith.constant 0 : index
    %9 = vector.load %arg4[%c0_6, %c0_7] : memref<256x256xbf16, #tpu.memory_space<vmem>>, vector<256x256xbf16>
    %cst_8 = arith.constant dense<0.000000e+00> : vector<16x256xf32>
    %10 = tpu.matmul %8, %9, %cst_8 {dimension_numbers = #tpu.dot_dimension_numbers<[1], [0], [0], [1], [0, 0, 1, 1], [], []>} : vector<16x256xbf16>, vector<256x256xbf16>, vector<16x256xf32> -> vector<16x256xf32>
    %c0_9 = arith.constant 0 : index
    %c0_10 = arith.constant 0 : index
    %11 = vector.load %arg5[%c0_9, %c0_10] : memref<1x256xf32, #tpu.memory_space<vmem>>, vector<1x256xf32>
    %12 = vector.broadcast %11 : vector<1x256xf32> to vector<16x256xf32>
    %13 = arith.addf %10, %12 : vector<16x256xf32>
    %cst_11 = arith.constant 0.000000e+00 : f32
    %14 = vector.broadcast %cst_11 : f32 to vector<16x256xf32>
    %15 = arith.maximumf %13, %14 : vector<16x256xf32>
    %16 = arith.truncf %15 : vector<16x256xf32> to vector<16x256xbf16>
    %c0_12 = arith.constant 0 : index
    %c0_13 = arith.constant 0 : index
    %17 = vector.load %arg6[%c0_12, %c0_13] : memref<256x256xbf16, #tpu.memory_space<vmem>>, vector<256x256xbf16>
    %cst_14 = arith.constant dense<0.000000e+00> : vector<16x256xf32>
    %18 = tpu.matmul %16, %17, %cst_14 {dimension_numbers = #tpu.dot_dimension_numbers<[1], [0], [0], [1], [0, 0, 1, 1], [], []>} : vector<16x256xbf16>, vector<256x256xbf16>, vector<16x256xf32> -> vector<16x256xf32>
    %c0_15 = arith.constant 0 : index
    %c0_16 = arith.constant 0 : index
    %19 = vector.load %arg7[%c0_15, %c0_16] : memref<1x256xf32, #tpu.memory_space<vmem>>, vector<1x256xf32>
    %20 = vector.broadcast %19 : vector<1x256xf32> to vector<16x256xf32>
    %21 = arith.addf %18, %20 : vector<16x256xf32>
    %cst_17 = arith.constant 0.000000e+00 : f32
    %22 = vector.broadcast %cst_17 : f32 to vector<16x256xf32>
    %23 = arith.maximumf %21, %22 : vector<16x256xf32>
    %24 = arith.truncf %23 : vector<16x256xf32> to vector<16x256xbf16>
    %c0_18 = arith.constant 0 : index
    %c0_19 = arith.constant 0 : index
    %25 = vector.load %arg8[%c0_18, %c0_19] : memref<256x1xbf16, #tpu.memory_space<vmem>>, vector<256x1xbf16>
    %cst_20 = arith.constant dense<0.000000e+00> : vector<16x1xf32>
    %26 = tpu.matmul %24, %25, %cst_20 {dimension_numbers = #tpu.dot_dimension_numbers<[1], [0], [0], [1], [0, 0, 1, 1], [], []>} : vector<16x256xbf16>, vector<256x1xbf16>, vector<16x1xf32> -> vector<16x1xf32>
    %c0_21 = arith.constant 0 : index
    %c0_22 = arith.constant 0 : index
    %27 = vector.load %arg9[%c0_21, %c0_22] : memref<1x1xf32, #tpu.memory_space<vmem>>, vector<1x1xf32>
    %28 = vector.broadcast %27 : vector<1x1xf32> to vector<16x1xf32>
    %29 = arith.addf %26, %28 : vector<16x1xf32>
    %c0_23 = arith.constant 0 : index
    %c0_24 = arith.constant 0 : index
    %30 = vector.load %arg10[%c0_23, %c0_24] : memref<16x1xf32, #tpu.memory_space<vmem>>, vector<16x1xf32>
    tpu.vector_store %arg10[%c0_23, %c0_24], %29 {strides = array<i32>} : memref<16x1xf32, #tpu.memory_space<vmem>>, vector<16x1xf32>,
    return
  }
  func.func @transform_0(%arg0: i32) -> (i32, i32) {
    %c0_i32 = arith.constant 0 : i32
    %c0_i32_0 = arith.constant 0 : i32
    return %arg0, %c0_i32 : i32, i32
  }
  func.func @transform_1(%arg0: i32) -> (i32, i32) {
    %c0_i32 = arith.constant 0 : i32
    %c0_i32_0 = arith.constant 0 : i32
    %c0_i32_1 = arith.constant 0 : i32
    return %c0_i32, %c0_i32_0 : i32, i32
  }
  func.func @transform_2(%arg0: i32) -> (i32, i32) {
    %c0_i32 = arith.constant 0 : i32
    %c0_i32_0 = arith.constant 0 : i32
    %c0_i32_1 = arith.constant 0 : i32
    return %c0_i32, %c0_i32_0 : i32, i32
  }
  func.func @transform_3(%arg0: i32) -> (i32, i32) {
    %c0_i32 = arith.constant 0 : i32
    %c0_i32_0 = arith.constant 0 : i32
    %c0_i32_1 = arith.constant 0 : i32
    return %c0_i32, %c0_i32_0 : i32, i32
  }
  func.func @transform_4(%arg0: i32) -> (i32, i32) {
    %c0_i32 = arith.constant 0 : i32
    %c0_i32_0 = arith.constant 0 : i32
    %c0_i32_1 = arith.constant 0 : i32
    return %c0_i32, %c0_i32_0 : i32, i32
  }
  func.func @transform_5(%arg0: i32) -> (i32, i32) {
    %c0_i32 = arith.constant 0 : i32
    %c0_i32_0 = arith.constant 0 : i32
    %c0_i32_1 = arith.constant 0 : i32
    return %c0_i32, %c0_i32_0 : i32, i32
  }
  func.func @transform_6(%arg0: i32) -> (i32, i32) {
    %c0_i32 = arith.constant 0 : i32
    %c0_i32_0 = arith.constant 0 : i32
    %c0_i32_1 = arith.constant 0 : i32
    return %c0_i32, %c0_i32_0 : i32, i32
  }
  func.func @transform_7(%arg0: i32) -> (i32, i32) {
    %c0_i32 = arith.constant 0 : i32
    %c0_i32_0 = arith.constant 0 : i32
    %c0_i32_1 = arith.constant 0 : i32
    return %c0_i32, %c0_i32_0 : i32, i32
  }
  func.func @transform_8(%arg0: i32) -> (i32, i32) {
    %c0_i32 = arith.constant 0 : i32
    %c0_i32_0 = arith.constant 0 : i32
    %c0_i32_1 = arith.constant 0 : i32
    return %c0_i32, %c0_i32_0 : i32, i32
  }
  func.func @transform_9(%arg0: i32) -> (i32, i32) {
    %c0_i32 = arith.constant 0 : i32
    %c0_i32_0 = arith.constant 0 : i32
    return %arg0, %c0_i32 : i32, i32
  }
}

</mosaic_0001>

<bundles_post_ra>
// kernel: tpu_custom_call.1
= control target key start
LH: loop header
LB: loop body
LE: loop exit
PB: predicated region body
PF: predicated region fallthrough
CT: control target
= control target key end

     0   :  { %s1443_s0 = inlined_call_operand.vmem [shape: bf16[16,12], index: 0, kind: input, shape index: {}]   ;;  %s1444_s1 = inlined_call_operand.vmem [shape: bf16[12,256], index: 1, kind: input, shape index: {}]   ;;  %s1445_s2 = inlined_call_operand.vmem [shape: f32[1,256], index: 2, kind: input, shape index: {}]   ;;  %s1446_s3 = inlined_call_operand.hbm [shape: bf16[256,256], index: 3, kind: input, shape index: {}]   ;;  %s1447_s4 = inlined_call_operand.vmem [shape: f32[1,256], index: 4, kind: input, shape index: {}]   ;;  %s1448_s5 = inlined_call_operand.hbm [shape: bf16[256,256], index: 5, kind: input, shape index: {}]   ;;  %s1449_s6 = inlined_call_operand.vmem [shape: f32[1,256], index: 6, kind: input, shape index: {}]   ;;  %s1450_s7 = inlined_call_operand.vmem [shape: bf16[256,1], index: 7, kind: input, shape index: {}]   ;;  %s1451_s8 = inlined_call_operand.<no memory space> [shape: f32[1,1], index: 8, kind: input, shape index: {}]   ;;  %s1452_s9 = inlined_call_operand.vmem [shape: f32[16,1], index: 9, kind: output, shape index: {}]  }
   0x1   :  { %v14_v0 = vstv %s1451_s8 }
   0x2   :  { %15 = vst [vmem:[#allocation2] sm:$0x1] %v14_v0 }
   0x3   :  { %16 = vsyncpa [#allocation4], 0  ;;  %s28_s13 = sshll.u32 %s1446_s3, 4  ;;  %s29_s13 = int_to_ptr.hbm [resolvable:$true] %s28_s13 }
   0x4   :  { %17 = vsyncpa [#allocation6], 0  ;;  %s1298_s14 = smov [#allocation3]   ;;  %s43_s18 = sshll.u32 %s1448_s5, 4  ;;  %s44_s18 = int_to_ptr.hbm [resolvable:$true] %s43_s18 }
   0x5   :  { %s30_s15 = sshll.u32 %s1298_s14, 4  ;;  %s1299_s19 = smov 128   ;;  %s31_s15 = int_to_ptr.vmem [resolvable:$true] %s30_s15 }
   0x6   :  { %s1300_s20 = smov 8   ;;  %s1301_s8 = smov [#allocation5]  }
   0x7   :  { %36 = dma.hbm_to_vmem [thread:$0]  %s29_s13, 4096, %s31_s15, [#allocation4], %s1299_s19, %s1299_s19, %s1300_s20  }
   0x8   :  { %s45_s21 = sshll.u32 %s1301_s8, 4  ;;  %s46_s21 = int_to_ptr.vmem [resolvable:$true] %s45_s21 }
   0x9   :  { %51 = dma.hbm_to_vmem [thread:$0]  %s44_s18, 4096, %s46_s21, [#allocation6], %s1299_s19, %s1299_s19, %s1300_s20  }
   0xa   :  { %1294 = dma.done.wait [#allocation4], 4096  }
   0xb   :  { %1295 = vsyncadd [#allocation4], 4294963200 }
   0xc   :  { %1296 = dma.done.wait [#allocation6], 4096  }
   0xd   :  { %1297 = vsyncadd [#allocation6], 4294963200  ;;  %vm94_vm0 = vcmask 1045504   ;;  %v830_v1 = vld [vmem:[%s1444_s1] sm:$0xf]  ;;  %vm90_vm1 = vcmask 97280  }
   0xe   :  { %v1160_v2 = vld [vmem:[%s1444_s1 + $0x4] sm:$0x30]  ;;  %v1159_v3 = vld [vmem:[%s1444_s1 + $0x4] sm:$0xf]  ;;  %v832_v5 = vld [vmem:[%s1444_s1 + $0x8] sm:$0x30] }
   0xf   :  { %v831_v4 = vor.u32 %v1160_v2, %v830_v1  ;;  %v896_v6 = vld [vmem:[#allocation3 + $0x70] sm:$0xf]  ;;  %v835_v7 = vor.u32 %v1159_v3, %v832_v5  ;;  %v1176_v8 = vld [vmem:[#allocation3 + $0x74] sm:$0xf0]  ;;  %v1158_v12 = vld [vmem:[%s1443_s0] sm:$0xff]  ;;  %vm815_vm2 = vcmask 7168  }
  0x10   :  { %v960_v9 = vld [vmem:[#allocation3 + $0xf0] sm:$0xf]  ;;  %v1192_v10 = vld [vmem:[#allocation3 + $0xf4] sm:$0xf0]  ;;  %v897_v13 = vor.u32 %v1176_v8, %v896_v6  ;;  %v1175_v15 = vld [vmem:[#allocation3 + $0x74] sm:$0xf] }
  0x11   :  { %v96_v11 = vsel %vm94_vm0, %v831_v4, 0  ;;  %v961_v14 = vor.u32 %v1192_v10, %v960_v9  ;;  %v898_v16 = vld [vmem:[#allocation3 + $0x78] sm:$0xf0]  ;;  %v99_v17 = vsel %vm94_vm0, %v835_v7, 0  ;;  %v1191_v19 = vld [vmem:[#allocation3 + $0xf4] sm:$0xf] }
  0x12   :  { %108 = vmatpush.bf16.msra.mxu0 %v96_v11  ;;  %v901_v18 = vor.u32 %v1175_v15, %v898_v16  ;;  %v962_v20 = vld [vmem:[#allocation3 + $0xf8] sm:$0xf0]  ;;  %122 = vmatpush.bf16.msra.mxu1 %v99_v17  ;;  %v888_v22 = vld [vmem:[#allocation3 + $0x60] sm:$0xf]  ;;  %v1174_v23 = vld [vmem:[#allocation3 + $0x64] sm:$0xf0] }
  0x13   :  { %333 = vmatpush.bf16.msra.mxu2 %v897_v13  ;;  %v965_v21 = vor.u32 %v1191_v19, %v962_v20  ;;  %v952_v24 = vld [vmem:[#allocation3 + $0xe0] sm:$0xf]  ;;  %347 = vmatpush.bf16.msra.mxu3 %v961_v14  ;;  %v889_v25 = vor.u32 %v1174_v23, %v888_v22  ;;  %v1190_v26 = vld [vmem:[#allocation3 + $0xe4] sm:$0xf0]  ;;  %v1173_v27 = vld [vmem:[#allocation3 + $0x64] sm:$0xf] }
  0x14   :  { %v890_v28 = vld [vmem:[#allocation3 + $0x68] sm:$0xf0]  ;;  %v953_v29 = vor.u32 %v1190_v26, %v952_v24  ;;  %v1189_v31 = vld [vmem:[#allocation3 + $0xe4] sm:$0xf]  ;;  %v880_v33 = vld [vmem:[#allocation3 + $0x50] sm:$0xf] }
  0x15   :  { %836 = vmatmul.msk.bf16.vlgmr.msra.gmra.mxu0 %vm90_vm1, %v1158_v12  ;;  %v893_v30 = vor.u32 %v1173_v27, %v890_v28  ;;  %v954_v32 = vld [vmem:[#allocation3 + $0xe8] sm:$0xf0]  ;;  %837 = vmatmul.msk.bf16.vlgmr.msra.gmra.mxu1 %vm90_vm1, %v1158_v12  ;;  %v1172_v35 = vld [vmem:[#allocation3 + $0x54] sm:$0xf0]  ;;  %v944_v36 = vld [vmem:[#allocation3 + $0xd0] sm:$0xf] }
  0x16   :  { %361 = vmatpush.bf16.msrb.mxu0 %v901_v18  ;;  %375 = vmatpush.bf16.msrb.mxu1 %v965_v21  ;;  %v957_v34 = vor.u32 %v1189_v31, %v954_v32  ;;  %v1188_v37 = vld [vmem:[#allocation3 + $0xd4] sm:$0xf0]  ;;  %v881_v38 = vor.u32 %v1172_v35, %v880_v33  ;;  %v1171_v39 = vld [vmem:[#allocation3 + $0x54] sm:$0xf]  ;;  %v882_v40 = vld [vmem:[#allocation3 + $0x58] sm:$0xf0] }
  0x17   :  { %334 = vmatpush.bf16.msra.mxu2 %v889_v25  ;;  %v1187_v41 = vld [vmem:[#allocation3 + $0xd4] sm:$0xf]  ;;  %348 = vmatpush.bf16.msra.mxu3 %v953_v29  ;;  %v945_v42 = vor.u32 %v1188_v37, %v944_v36  ;;  %v885_v43 = vor.u32 %v1171_v39, %v882_v40  ;;  %v946_v44 = vld [vmem:[#allocation3 + $0xd8] sm:$0xf0]  ;;  %v872_v45 = vld [vmem:[#allocation3 + $0x40] sm:$0xf] }
  0x18   :  { %v1170_v46 = vld [vmem:[#allocation3 + $0x44] sm:$0xf0]  ;;  %v949_v47 = vor.u32 %v1187_v41, %v946_v44  ;;  %v936_v48 = vld [vmem:[#allocation3 + $0xc0] sm:$0xf]  ;;  %v1169_v50 = vld [vmem:[#allocation3 + $0x44] sm:$0xf] }
  0x19   :  { %v1186_v49 = vld [vmem:[#allocation3 + $0xc4] sm:$0xf0]  ;;  %v874_v51 = vld [vmem:[#allocation3 + $0x48] sm:$0xf0]  ;;  %v1185_v52 = vld [vmem:[#allocation3 + $0xc4] sm:$0xf]  ;;  %v873_v54 = vor.u32 %v1170_v46, %v872_v45 }
  0x1a   :  { %362 = vmatpush.bf16.msrb.mxu0 %v893_v30  ;;  %376 = vmatpush.bf16.msrb.mxu1 %v957_v34  ;;  %v938_v53 = vld [vmem:[#allocation3 + $0xc8] sm:$0xf0]  ;;  %v937_v55 = vor.u32 %v1186_v49, %v936_v48  ;;  %v877_v56 = vor.u32 %v1169_v50, %v874_v51  ;;  %v864_v58 = vld [vmem:[#allocation3 + $0x30] sm:$0xf]  ;;  %v1168_v59 = vld [vmem:[#allocation3 + $0x34] sm:$0xf0] }
  0x1b   :  { %335 = vmatpush.bf16.msra.mxu2 %v881_v38  ;;  %349 = vmatpush.bf16.msra.mxu3 %v945_v42  ;;  %v941_v57 = vor.u32 %v1185_v52, %v938_v53  ;;  %v928_v60 = vld [vmem:[#allocation3 + $0xb0] sm:$0xf]  ;;  %v865_v61 = vor.u32 %v1168_v59, %v864_v58  ;;  %v1184_v62 = vld [vmem:[#allocation3 + $0xb4] sm:$0xf0]  ;;  %v1167_v63 = vld [vmem:[#allocation3 + $0x34] sm:$0xf] }
  0x1c   :  { %v866_v0 = vld [vmem:[#allocation3 + $0x38] sm:$0xf0]  ;;  %v929_v1 = vor.u32 %v1184_v62, %v928_v60  ;;  %v1183_v3 = vld [vmem:[#allocation3 + $0xb4] sm:$0xf]  ;;  %v856_v6 = vld [vmem:[#allocation3 + $0x20] sm:$0xf] }
  0x1d   :  { %v869_v2 = vor.u32 %v1167_v63, %v866_v0  ;;  %v930_v4 = vld [vmem:[#allocation3 + $0xb8] sm:$0xf0]  ;;  %v1166_v7 = vld [vmem:[#allocation3 + $0x24] sm:$0xf0]  ;;  %v920_v9 = vld [vmem:[#allocation3 + $0xa0] sm:$0xf] }
  0x1e   :  { %363 = vmatpush.bf16.msrb.mxu0 %v885_v43  ;;  %377 = vmatpush.bf16.msrb.mxu1 %v949_v47  ;;  %v933_v5 = vor.u32 %v1183_v3, %v930_v4  ;;  %v857_v8 = vor.u32 %v1166_v7, %v856_v6  ;;  %v1182_v10 = vld [vmem:[#allocation3 + $0xa4] sm:$0xf0]  ;;  %v1165_v11 = vld [vmem:[#allocation3 + $0x24] sm:$0xf]  ;;  %v858_v13 = vld [vmem:[#allocation3 + $0x28] sm:$0xf0] }
  0x1f   :  { %336 = vmatpush.bf16.msra.mxu2 %v873_v54  ;;  %350 = vmatpush.bf16.msra.mxu3 %v937_v55  ;;  %v921_v12 = vor.u32 %v1182_v10, %v920_v9  ;;  %v1181_v14 = vld [vmem:[#allocation3 + $0xa4] sm:$0xf]  ;;  %v922_v15 = vld [vmem:[#allocation3 + $0xa8] sm:$0xf0]  ;;  %v861_v16 = vor.u32 %v1165_v11, %v858_v13  ;;  %v848_v18 = vld [vmem:[#allocation3 + $0x10] sm:$0xf] }
  0x20   :  { %v925_v17 = vor.u32 %v1181_v14, %v922_v15  ;;  %v1164_v19 = vld [vmem:[#allocation3 + $0x14] sm:$0xf0]  ;;  %v912_v20 = vld [vmem:[#allocation3 + $0x90] sm:$0xf]  ;;  %v1163_v23 = vld [vmem:[#allocation3 + $0x14] sm:$0xf] }
  0x21   :  { %v849_v21 = vor.u32 %v1164_v19, %v848_v18  ;;  %v1180_v22 = vld [vmem:[#allocation3 + $0x94] sm:$0xf0]  ;;  %v850_v24 = vld [vmem:[#allocation3 + $0x18] sm:$0xf0]  ;;  %v1179_v27 = vld [vmem:[#allocation3 + $0x94] sm:$0xf] }
  0x22   :  { %364 = vmatpush.bf16.msrb.mxu0 %v877_v56  ;;  %378 = vmatpush.bf16.msrb.mxu1 %v941_v57  ;;  %v913_v25 = vor.u32 %v1180_v22, %v912_v20  ;;  %v853_v26 = vor.u32 %v1163_v23, %v850_v24  ;;  %v914_v28 = vld [vmem:[#allocation3 + $0x98] sm:$0xf0]  ;;  %v840_v30 = vld [vmem:[#allocation3] sm:$0xf]  ;;  %v1162_v31 = vld [vmem:[#allocation3 + $0x4] sm:$0xf0] }
  0x23   :  { %337 = vmatpush.bf16.msra.mxu2 %v865_v61  ;;  %351 = vmatpush.bf16.msra.mxu3 %v929_v1  ;;  %v917_v29 = vor.u32 %v1179_v27, %v914_v28  ;;  %v904_v32 = vld [vmem:[#allocation3 + $0x80] sm:$0xf]  ;;  %v841_v33 = vor.u32 %v1162_v31, %v840_v30  ;;  %v1178_v34 = vld [vmem:[#allocation3 + $0x84] sm:$0xf0]  ;;  %v1161_v35 = vld [vmem:[#allocation3 + $0x4] sm:$0xf] }
  0x24   :  { %v842_v36 = vld [vmem:[#allocation3 + $0x8] sm:$0xf0]  ;;  %v905_v37 = vor.u32 %v1178_v34, %v904_v32  ;;  %v1177_v39 = vld [vmem:[#allocation3 + $0x84] sm:$0xf]  ;;  %v1088_v42 = vld [vmem:[#allocation5 + $0xf0] sm:$0xf] }
  0x25   :  { %v845_v38 = vor.u32 %v1161_v35, %v842_v36  ;;  %v906_v40 = vld [vmem:[#allocation3 + $0x88] sm:$0xf0]  ;;  %v1224_v43 = vld [vmem:[#allocation5 + $0xf4] sm:$0xf0]  ;;  %v1223_v44 = vld [vmem:[#allocation5 + $0xf4] sm:$0xf] }
  0x26   :  { %365 = vmatpush.bf16.msrb.mxu0 %v869_v2  ;;  %379 = vmatpush.bf16.msrb.mxu1 %v933_v5  ;;  %v909_v41 = vor.u32 %v1177_v39, %v906_v40  ;;  %v1089_v45 = vor.u32 %v1224_v43, %v1088_v42  ;;  %v1090_v46 = vld [vmem:[#allocation5 + $0xf8] sm:$0xf0]  ;;  %v1080_v47 = vld [vmem:[#allocation5 + $0xe0] sm:$0xf]  ;;  %v1222_v48 = vld [vmem:[#allocation5 + $0xe4] sm:$0xf0] }
  0x27   :  { %338 = vmatpush.bf16.msra.mxu2 %v857_v8  ;;  %352 = vmatpush.bf16.msra.mxu3 %v921_v12  ;;  %v1093_v49 = vor.u32 %v1223_v44, %v1090_v46  ;;  %v1221_v50 = vld [vmem:[#allocation5 + $0xe4] sm:$0xf]  ;;  %v1082_v51 = vld [vmem:[#allocation5 + $0xe8] sm:$0xf0]  ;;  %v1024_v52 = vld [vmem:[#allocation5 + $0x70] sm:$0xf]  ;;  %v1081_v53 = vor.u32 %v1222_v48, %v1080_v47 }
  0x28   :  { %v1208_v54 = vld [vmem:[#allocation5 + $0x74] sm:$0xf0]  ;;  %v1207_v55 = vld [vmem:[#allocation5 + $0x74] sm:$0xf]  ;;  %v1026_v56 = vld [vmem:[#allocation5 + $0x78] sm:$0xf0]  ;;  %v1085_v57 = vor.u32 %v1221_v50, %v1082_v51 }
  0x29   :  { %v1025_v58 = vor.u32 %v1208_v54, %v1024_v52  ;;  %v1029_v59 = vor.u32 %v1207_v55, %v1026_v56  ;;  %v1072_v60 = vld [vmem:[#allocation5 + $0xd0] sm:$0xf]  ;;  %v1220_v61 = vld [vmem:[#allocation5 + $0xd4] sm:$0xf0]  ;;  %v1219_v62 = vld [vmem:[#allocation5 + $0xd4] sm:$0xf] }
  0x2a   :  { %366 = vmatpush.bf16.msrb.mxu0 %v861_v16  ;;  %380 = vmatpush.bf16.msrb.mxu1 %v925_v17  ;;  %v1074_v63 = vld [vmem:[#allocation5 + $0xd8] sm:$0xf0]  ;;  %v1016_v0 = vld [vmem:[#allocation5 + $0x60] sm:$0xf]  ;;  %v1206_v1 = vld [vmem:[#allocation5 + $0x64] sm:$0xf0]  ;;  %v1073_v5 = vor.u32 %v1220_v61, %v1072_v60 }
  0x2b   :  { %339 = vmatpush.bf16.msra.mxu2 %v849_v21  ;;  %353 = vmatpush.bf16.msra.mxu3 %v913_v25  ;;  %v1017_v2 = vor.u32 %v1206_v1, %v1016_v0  ;;  %v1205_v3 = vld [vmem:[#allocation5 + $0x64] sm:$0xf]  ;;  %v1018_v4 = vld [vmem:[#allocation5 + $0x68] sm:$0xf0]  ;;  %v1077_v7 = vor.u32 %v1219_v62, %v1074_v63  ;;  %v1064_v8 = vld [vmem:[#allocation5 + $0xc0] sm:$0xf] }
  0x2c   :  { %v1021_v6 = vor.u32 %v1205_v3, %v1018_v4  ;;  %v1218_v9 = vld [vmem:[#allocation5 + $0xc4] sm:$0xf0]  ;;  %v1217_v10 = vld [vmem:[#allocation5 + $0xc4] sm:$0xf]  ;;  %v1066_v11 = vld [vmem:[#allocation5 + $0xc8] sm:$0xf0] }
  0x2d   :  { %v1065_v12 = vor.u32 %v1218_v9, %v1064_v8  ;;  %v1069_v13 = vor.u32 %v1217_v10, %v1066_v11  ;;  %v71_v14 = vld [vmem:[%s1445_s2] sm:$0x3]  ;;  %v1008_v31 = vld [vmem:[#allocation5 + $0x50] sm:$0xf]  ;;  %v1204_v32 = vld [vmem:[#allocation5 + $0x54] sm:$0xf0] }
  0x2e   :  { %367 = vmatpush.bf16.msrb.mxu0 %v853_v26  ;;  %381 = vmatpush.bf16.msrb.mxu1 %v917_v29  ;;  %v73_v17 = vperm.slane %v71_v14, 0  ;;  %v74_v18 = vperm.slane %v71_v14, 1  ;;  %v1009_v34 = vor.u32 %v1204_v32, %v1008_v31  ;;  %v1010_v35 = vld [vmem:[#allocation5 + $0x58] sm:$0xf0]  ;;  %v1215_v39 = vld [vmem:[#allocation5 + $0xb4] sm:$0xf] }
  0x2f   :  { %340 = vmatpush.bf16.msra.mxu2 %v841_v33  ;;  %354 = vmatpush.bf16.msra.mxu3 %v905_v37  ;;  %v1203_v33 = vld [vmem:[#allocation5 + $0x54] sm:$0xf]  ;;  %v1056_v37 = vld [vmem:[#allocation5 + $0xb0] sm:$0xf]  ;;  %v1000_v43 = vld [vmem:[#allocation5 + $0x40] sm:$0xf] }
  0x30   :  { %v1013_v36 = vor.u32 %v1203_v33, %v1010_v35  ;;  %v1202_v44 = vld [vmem:[#allocation5 + $0x44] sm:$0xf0]  ;;  %v1002_v47 = vld [vmem:[#allocation5 + $0x48] sm:$0xf0]  ;;  %v1213_v51 = vld [vmem:[#allocation5 + $0xa4] sm:$0xf] }
  0x31   :  { %v1001_v46 = vor.u32 %v1202_v44, %v1000_v43  ;;  %v1214_v50 = vld [vmem:[#allocation5 + $0xa4] sm:$0xf0]  ;;  %v992_v55 = vld [vmem:[#allocation5 + $0x30] sm:$0xf]  ;;  %v1200_v56 = vld [vmem:[#allocation5 + $0x34] sm:$0xf0] }
  0x32   :  { %368 = vmatpush.bf16.msrb.mxu0 %v845_v38  ;;  %382 = vmatpush.bf16.msrb.mxu1 %v909_v41  ;;  %v1216_v38 = vld [vmem:[#allocation5 + $0xb4] sm:$0xf0]  ;;  %v1058_v41 = vld [vmem:[#allocation5 + $0xb8] sm:$0xf0]  ;;  %v1040_v61 = vld [vmem:[#allocation5 + $0x90] sm:$0xf] }
  0x33   :  { %607 = vmatpush.bf16.msrb.mxu3 %v1089_v45  ;;  %593 = vmatpush.bf16.msrb.mxu2 %v1025_v58  ;;  %v1057_v40 = vor.u32 %v1216_v38, %v1056_v37  ;;  %v1061_v42 = vor.u32 %v1215_v39, %v1058_v41  ;;  %v1201_v45 = vld [vmem:[#allocation5 + $0x44] sm:$0xf]  ;;  %v993_v58 = vor.u32 %v1200_v56, %v992_v55  ;;  %v1212_v62 = vld [vmem:[#allocation5 + $0x94] sm:$0xf0]  ;;  %v1211_v63 = vld [vmem:[#allocation5 + $0x94] sm:$0xf] }
  0x34   :  { %v1005_v48 = vor.u32 %v1201_v45, %v1002_v47  ;;  %v1041_v0 = vor.u32 %v1212_v62, %v1040_v61  ;;  %v1042_v1 = vld [vmem:[#allocation5 + $0x98] sm:$0xf0]  ;;  %v984_v3 = vld [vmem:[#allocation5 + $0x20] sm:$0xf]  ;;  %v1198_v4 = vld [vmem:[#allocation5 + $0x24] sm:$0xf0] }
  0x35   :  { %v1032_v9 = vld [vmem:[#allocation5 + $0x80] sm:$0xf]  ;;  %v1210_v10 = vld [vmem:[#allocation5 + $0x84] sm:$0xf0]  ;;  %v1209_v11 = vld [vmem:[#allocation5 + $0x84] sm:$0xf] }
  0x36   :  { %635 = vmatpush.bf16.msra.mxu1 %v1093_v49  ;;  %621 = vmatpush.bf16.msra.mxu0 %v1029_v59  ;;  %v1048_v49 = vld [vmem:[#allocation5 + $0xa0] sm:$0xf]  ;;  %v994_v59 = vld [vmem:[#allocation5 + $0x38] sm:$0xf0]  ;;  %v1238_v55 = vld [vmem:[%s1450_s7 + $0x68] sm:$0xff] }
  0x37   :  { %608 = vmatpush.bf16.msrb.mxu3 %v1081_v53  ;;  %594 = vmatpush.bf16.msrb.mxu2 %v1017_v2  ;;  %v1049_v52 = vor.u32 %v1214_v50, %v1048_v49  ;;  %v1050_v53 = vld [vmem:[#allocation5 + $0xa8] sm:$0xf0]  ;;  %v1045_v2 = vor.u32 %v1211_v63, %v1042_v1  ;;  %v1228_v62 = vld [vmem:[%s1450_s7 + $0x18] sm:$0xff]  ;;  %v1233_v1 = vld [vmem:[%s1450_s7 + $0x40] sm:$0xff] }
  0x38   :  { %v1053_v54 = vor.u32 %v1213_v51, %v1050_v53  ;;  %v1231_v56 = vld [vmem:[%s1450_s7 + $0x30] sm:$0xff]  ;;  %v1234_v63 = vld [vmem:[%s1450_s7 + $0x48] sm:$0xff] }
  0x39   :  { %v1235_v61 = vld [vmem:[%s1450_s7 + $0x50] sm:$0xff] }
  0x3a   :  { %636 = vmatpush.bf16.msra.mxu1 %v1085_v57  ;;  %622 = vmatpush.bf16.msra.mxu0 %v1021_v6  ;;  %v1199_v57 = vld [vmem:[#allocation5 + $0x34] sm:$0xf]  ;;  %v985_v6 = vor.u32 %v1198_v4, %v984_v3  ;;  %v1225_v3 = vld [vmem:[%s1450_s7] sm:$0xff] }
  0x3b   :  { %609 = vmatpush.bf16.msrb.mxu3 %v1073_v5  ;;  %595 = vmatpush.bf16.msrb.mxu2 %v1009_v34  ;;  %v997_v60 = vor.u32 %v1199_v57, %v994_v59  ;;  %v1197_v5 = vld [vmem:[#allocation5 + $0x24] sm:$0xf]  ;;  %v1236_v59 = vld [vmem:[%s1450_s7 + $0x58] sm:$0xff]  ;;  %v427_v4 = vld [vmem:[%s1449_s6] sm:$0x3] }
  0x3c   :  { %v1237_v57 = vld [vmem:[%s1450_s7 + $0x60] sm:$0xff] }
  0x3e   :  { %637 = vmatpush.bf16.msra.mxu1 %v1077_v7  ;;  %623 = vmatpush.bf16.msra.mxu0 %v1013_v36  ;;  %v986_v7 = vld [vmem:[#allocation5 + $0x28] sm:$0xf0] }
  0x3f   :  { %610 = vmatpush.bf16.msrb.mxu3 %v1065_v12  ;;  %596 = vmatpush.bf16.msrb.mxu2 %v1001_v46  ;;  %v989_v8 = vor.u32 %v1197_v5, %v986_v7  ;;  %v1033_v12 = vor.u32 %v1210_v10, %v1032_v9  ;;  %v430_v7 = vperm.slane %v427_v4, 1 }
  0x42   :  { %638 = vmatpush.bf16.msra.mxu1 %v1069_v13  ;;  %624 = vmatpush.bf16.msra.mxu0 %v1005_v48  ;;  %v1034_v13 = vld [vmem:[#allocation5 + $0x88] sm:$0xf0] }
  0x43   :  { %611 = vmatpush.bf16.msrb.mxu3 %v1057_v40  ;;  %597 = vmatpush.bf16.msrb.mxu2 %v993_v58  ;;  %v1037_v14 = vor.u32 %v1209_v11, %v1034_v13  ;;  %v1230_v58 = vld [vmem:[%s1450_s7 + $0x28] sm:$0xff]  ;;  %v429_v11 = vperm.slane %v427_v4, 0 }
  0x46   :  { %639 = vmatpush.bf16.msra.mxu1 %v1061_v42  ;;  %625 = vmatpush.bf16.msra.mxu0 %v997_v60  ;;  %v1229_v60 = vld [vmem:[%s1450_s7 + $0x20] sm:$0xff] }
  0x47   :  { %612 = vmatpush.bf16.msrb.mxu3 %v1049_v52  ;;  %598 = vmatpush.bf16.msrb.mxu2 %v985_v6 }
  0x4a   :  { %640 = vmatpush.bf16.msra.mxu1 %v1053_v54  ;;  %626 = vmatpush.bf16.msra.mxu0 %v989_v8 }
  0x4b   :  { %613 = vmatpush.bf16.msrb.mxu3 %v1041_v0  ;;  %v1227_v0 = vld [vmem:[%s1450_s7 + $0x10] sm:$0xff] }
  0x4e   :  { %641 = vmatpush.bf16.msra.mxu1 %v1045_v2  ;;  %v1226_v2 = vld [vmem:[%s1450_s7 + $0x8] sm:$0xff] }
  0x4f   :  { %614 = vmatpush.bf16.msrb.mxu3 %v1033_v12 }
  0x52   :  { %642 = vmatpush.bf16.msra.mxu1 %v1037_v14 }
  0x92   :  { %v110_v15 = vpop.f32.mrf.mxu0  ;;  %v124_v16 = vpop.f32.mrf.mxu1 }
  0x93   :  { %v111_v19 = vadd.f32 %v110_v15, %v73_v17  ;;  %v125_v20 = vadd.f32 %v124_v16, %v74_v18  ;;  %v976_v15 = vld [vmem:[#allocation5 + $0x10] sm:$0xf]  ;;  %v1196_v16 = vld [vmem:[#allocation5 + $0x14] sm:$0xf0] }
  0x95   :  { %v129_v25 = vmax.f32 %v111_v19, 0.0  ;;  %v130_v27 = vmax.f32 %v125_v20, 0.0  ;;  %v978_v19 = vld [vmem:[#allocation5 + $0x18] sm:$0xf0] }
  0x9a   :  { %v112_v21 = vpop.f32.mrf.mxu0  ;;  %v126_v23 = vpop.f32.mrf.mxu1 }
  0x9b   :  { %v113_v22 = vadd.f32 %v112_v21, %v73_v17  ;;  %v127_v24 = vadd.f32 %v126_v23, %v74_v18  ;;  %v1195_v17 = vld [vmem:[#allocation5 + $0x14] sm:$0xf]  ;;  %v977_v18 = vor.u32 %v1196_v16, %v976_v15  ;;  %v968_v21 = vld [vmem:[#allocation5] sm:$0xf]  ;;  %v1193_v23 = vld [vmem:[#allocation5 + $0x4] sm:$0xf] }
  0x9c   :  { %v981_v20 = vor.u32 %v1195_v17, %v978_v19 }
  0x9d   :  { %v131_v26 = vmax.f32 %v113_v22, 0.0  ;;  %v132_v28 = vmax.f32 %v127_v24, 0.0  ;;  %599 = vmatpush.bf16.msrb.mxu2 %v977_v18  ;;  %v1194_v22 = vld [vmem:[#allocation5 + $0x4] sm:$0xf0] }
  0x9e   :  { %627 = vmatpush.bf16.msra.mxu0 %v981_v20  ;;  %v969_v24 = vor.u32 %v1194_v22, %v968_v21 }
  0x9f   :  { %v133_v29 = vpack.c.bf16 %v131_v26, %v129_v25  ;;  %v134_v30 = vpack.c.bf16 %v132_v28, %v130_v27  ;;  %v970_v25 = vld [vmem:[#allocation5 + $0x8] sm:$0xf0]  ;;  %v1240_v27 = vld [vmem:[%s1450_s7 + $0x78] sm:$0xff] }
  0xa0   :  { %v973_v26 = vor.u32 %v1193_v23, %v970_v25  ;;  %v1232_v28 = vld [vmem:[%s1450_s7 + $0x38] sm:$0xff] }
  0xa1   :  { %341 = vmatmul.bf16.vlgmr.msra.gmra.mxu2 %v133_v29  ;;  %369 = vmatmul.bf16.vlgmr.msrb.gmra.mxu0 %v133_v29  ;;  %v1239_v29 = vld [vmem:[%s1450_s7 + $0x70] sm:$0xff] }
  0xa2   :  { %355 = vmatmul.bf16.vlgmr.msra.gmra.mxu3 %v134_v30  ;;  %383 = vmatmul.bf16.vlgmr.msrb.gmra.mxu1 %v134_v30  ;;  %v167_v30 = vld [vmem:[%s1447_s4] sm:$0x3] }
  0xa3   :  { %600 = vmatpush.bf16.msrb.mxu2 %v969_v24  ;;  %628 = vmatpush.bf16.msra.mxu0 %v973_v26  ;;  %v170_v32 = vperm.slane %v167_v30, 1  ;;  %v169_v36 = vperm.slane %v167_v30, 0 }
  0xa4   :  { %801 = vmatpush.bf16.msra.mxu3 %v1240_v27 }
  0xa7   :  { %787 = vmatpush.bf16.msra.mxu2 %v1232_v28 }
  0xa8   :  { %802 = vmatpush.bf16.msra.mxu3 %v1239_v29  ;;  %v1245_v29 = vld [vmem:[#allocation2] ss:$0 sm:$0xff] }
  0xab   :  { %788 = vmatpush.bf16.msra.mxu2 %v1231_v56 }
  0xac   :  { %803 = vmatpush.bf16.msra.mxu3 %v1238_v55 }
  0xaf   :  { %789 = vmatpush.bf16.msra.mxu2 %v1230_v58 }
  0xb0   :  { %804 = vmatpush.bf16.msra.mxu3 %v1237_v57 }
  0xb3   :  { %790 = vmatpush.bf16.msra.mxu2 %v1229_v60 }
  0xb4   :  { %805 = vmatpush.bf16.msra.mxu3 %v1236_v59 }
  0xb7   :  { %791 = vmatpush.bf16.msra.mxu2 %v1228_v62 }
  0xb8   :  { %806 = vmatpush.bf16.msra.mxu3 %v1235_v61 }
  0xbb   :  { %792 = vmatpush.bf16.msra.mxu2 %v1227_v0 }
  0xbc   :  { %807 = vmatpush.bf16.msra.mxu3 %v1234_v63 }
  0xbf   :  { %793 = vmatpush.bf16.msra.mxu2 %v1226_v2 }
  0xc0   :  { %808 = vmatpush.bf16.msra.mxu3 %v1233_v1 }
  0xc3   :  { %794 = vmatpush.bf16.msra.mxu2 %v1225_v3 }
 0x11e   :  { %v370_v31 = vpop.f32.mrf.mxu0 }
 0x11f   :  { %v384_v33 = vpop.f32.mrf.mxu1  ;;  %v371_v34 = vadd.f32 %v370_v31, %v170_v32 }
 0x121   :  { %v385_v39 = vadd.f32 %v384_v33, %v371_v34 }
 0x123   :  { %v390_v44 = vmax.f32 %v385_v39, 0.0 }
 0x124   :  { %v342_v35 = vpop.f32.mrf.mxu2 }
 0x125   :  { %v356_v37 = vpop.f32.mrf.mxu3  ;;  %v343_v42 = vadd.f32 %v342_v35, %v169_v36 }
 0x126   :  { %v372_v38 = vpop.f32.mrf.mxu0 }
 0x127   :  { %v373_v40 = vadd.f32 %v372_v38, %v170_v32  ;;  %v386_v41 = vpop.f32.mrf.mxu1  ;;  %v357_v47 = vadd.f32 %v356_v37, %v343_v42 }
 0x129   :  { %v387_v43 = vadd.f32 %v386_v41, %v373_v40  ;;  %v389_v52 = vmax.f32 %v357_v47, 0.0 }
 0x12b   :  { %v392_v45 = vmax.f32 %v387_v43, 0.0 }
 0x12c   :  { %v344_v46 = vpop.f32.mrf.mxu2 }
 0x12d   :  { %v394_v48 = vpack.c.bf16 %v392_v45, %v390_v44  ;;  %v345_v49 = vadd.f32 %v344_v46, %v169_v36  ;;  %v358_v50 = vpop.f32.mrf.mxu3 }
 0x12f   :  { %v359_v51 = vadd.f32 %v358_v50, %v345_v49  ;;  %615 = vmatmul.bf16.vlgmr.msrb.gmra.mxu3 %v394_v48  ;;  %643 = vmatmul.bf16.vlgmr.msra.gmra.mxu1 %v394_v48 }
 0x131   :  { %v391_v53 = vmax.f32 %v359_v51, 0.0 }
 0x133   :  { %v393_v54 = vpack.c.bf16 %v391_v53, %v389_v52 }
 0x135   :  { %601 = vmatmul.bf16.vlgmr.msrb.gmra.mxu2 %v393_v54  ;;  %629 = vmatmul.bf16.vlgmr.msra.gmra.mxu0 %v393_v54 }
 0x1ac   :  { %v644_v5 = vpop.f32.mrf.mxu1 }
 0x1b2   :  { %v630_v6 = vpop.f32.mrf.mxu0  ;;  %v616_v9 = vpop.f32.mrf.mxu3 }
 0x1b3   :  { %v631_v8 = vadd.f32 %v630_v6, %v430_v7 }
 0x1b4   :  { %v646_v15 = vpop.f32.mrf.mxu1 }
 0x1b5   :  { %v645_v13 = vadd.f32 %v644_v5, %v631_v8 }
 0x1b7   :  { %v650_v18 = vmax.f32 %v645_v13, 0.0 }
 0x1b8   :  { %v602_v10 = vpop.f32.mrf.mxu2 }
 0x1b9   :  { %v603_v16 = vadd.f32 %v602_v10, %v429_v11 }
 0x1ba   :  { %v632_v12 = vpop.f32.mrf.mxu0  ;;  %v618_v24 = vpop.f32.mrf.mxu3 }
 0x1bb   :  { %v633_v14 = vadd.f32 %v632_v12, %v430_v7  ;;  %v617_v21 = vadd.f32 %v616_v9, %v603_v16 }
 0x1bd   :  { %v647_v17 = vadd.f32 %v646_v15, %v633_v14  ;;  %v649_v26 = vmax.f32 %v617_v21, 0.0 }
 0x1bf   :  { %v652_v19 = vmax.f32 %v647_v17, 0.0 }
 0x1c0   :  { %v604_v20 = vpop.f32.mrf.mxu2 }
 0x1c1   :  { %v654_v22 = vpack.c.bf16 %v652_v19, %v650_v18  ;;  %v605_v23 = vadd.f32 %v604_v20, %v429_v11 }
 0x1c3   :  { %v619_v25 = vadd.f32 %v618_v24, %v605_v23  ;;  %809 = vmatmul.bf16.vlgmr.msra.gmra.mxu3 %v654_v22 }
 0x1c5   :  { %v651_v27 = vmax.f32 %v619_v25, 0.0 }
 0x1c7   :  { %v653_v28 = vpack.c.bf16 %v651_v27, %v649_v26 }
 0x1c9   :  { %795 = vmatmul.bf16.vlgmr.msra.gmra.mxu2 %v653_v28 }
 0x246   :  { %v810_v30 = vpop.f32.mrf.mxu3 }
 0x24c   :  { %v796_v31 = vpop.f32.mrf.mxu2 }
 0x24d   :  { %v797_v32 = vadd.f32 %v1245_v29, %v796_v31 }
 0x24e   :  { %v812_v36 = vpop.f32.mrf.mxu3 }
 0x24f   :  { %v811_v33 = vadd.f32 %v810_v30, %v797_v32 }
 0x251   :  { %816 = vst.msk [vmem:[%s1452_s9] sm:$0xff] %vm815_vm2, %v811_v33 }
 0x254   :  { %v798_v34 = vpop.f32.mrf.mxu2 }
 0x255   :  { %v799_v35 = vadd.f32 %v1245_v29, %v798_v34 }
 0x257   :  { %v813_v37 = vadd.f32 %v812_v36, %v799_v35 }
 0x259   :  { %817 = vst.msk [vmem:[%s1452_s9 + $0x8] sm:$0xff] %vm815_vm2, %v813_v37 }
 0x25a   :  { %822 = vsyncpa [#allocation4], 1 }
 0x25b   :  { %823 = vsyncpa [#allocation6], 1 }

</bundles_post_ra>
